<compile_context>
chip_gen: v7x
topology: tpu7x:2x2x1
jax: 0.10.0
libtpu: 0.0.40
codegen_flags: <defaults>
</compile_context>

<pallas_src>
import functools
import math

import jax
import jax.numpy as jnp
from jax.experimental import pallas as pl
from jax.experimental.pallas import tpu as pltpu


# -----------------------------------------------------------------------------
# Kernels
# -----------------------------------------------------------------------------

def _full_rep_kernel(rep_ref, x_ref, o_ref, *, precision):
    """Small-W path: one MXU matmul against a 0/1 matrix produces the whole
    lane-dense output slab (width repeat + height repeat + row-group packing
    are all folded into `rep`)."""
    o_ref[...] = jnp.dot(
        x_ref[...], rep_ref[...],
        preferred_element_type=jnp.float32,
        precision=precision,
    ).astype(o_ref.dtype)


def _width_rep_kernel(rep_ref, x_ref, o_ref, *, s, wc, nw, precision):
    """Large-W path: the MXU only does the width repeat (0/1 chunk matrix of
    shape (wc, wc*s)); the s height copies are plain lane-slice stores of the
    same tile, so MXU flops and rep VMEM are s x smaller than a fused rep."""
    wcs = wc * s
    wo = nw * wcs                       # = W * s, one upsampled row
    for jw in range(nw):                # static unroll over width chunks (usually nw == 1)
        tmp = jnp.dot(
            x_ref[:, jw * wc:(jw + 1) * wc], rep_ref[...],
            preferred_element_type=jnp.float32,
            precision=precision,
        ).astype(o_ref.dtype)
        for c in range(s):              # height repeat: s stores, no extra MXU work
            o_ref[:, c * wo + jw * wcs:c * wo + (jw + 1) * wcs] = tmp


# -----------------------------------------------------------------------------
# Sizing heuristics
# -----------------------------------------------------------------------------

def _vmem_limit_bytes():
    """Generation-aware VMEM budget (v5e/v6e: 128 MiB, v7x: 64 MiB per core),
    with headroom for Mosaic internal scratch."""
    cap = 64 * 1024 * 1024
    try:
        info_cap = int(pltpu.get_tpu_info().vmem_capacity_bytes)
        if info_cap > 0:
            cap = info_cap
    except Exception:  # non-TPU / older runtime: stay at the conservative 64 MiB
        pass
    return min(cap - (8 << 20), int(cap * 0.85))


def _sublane(itemsize):
    # f32 -> 8, bf16/f16 -> 16 (sub-32-bit dtypes pack along sublanes)
    return 8 * max(1, 4 // max(1, itemsize))


def _choose_row_block(rows, per_row_bytes, budget_bytes, sub):
    """Row-block size: as large as the double-buffered VMEM budget allows,
    sublane-aligned, preferring divisors of `rows` with an even step count so
    the 2 TensorCores of a v7x chip get balanced work on the 'parallel' axis."""
    if rows <= sub:
        return rows
    budget_bytes = max(budget_bytes, per_row_bytes * sub)
    max_rows = max(sub, (budget_bytes // per_row_bytes) // sub * sub)
    block = min(max_rows, (rows // sub) * sub)
    if block >= rows:
        # Whole problem fits in one block: split into 2 balanced steps (megacore).
        # On 1-TC parts the extra step costs ~0.35 us, noise at this size.
        half = (rows + 1) // 2
        return ((half + sub - 1) // sub) * sub
    best_div = None
    b = block
    while b >= max(sub, block // 2):
        if rows % b == 0:
            if (rows // b) % 2 == 0:
                return b                 # even, evenly dividing -> best
            if best_div is None:
                best_div = b
        b -= sub
    return best_div if best_div is not None else block


def _choose_group(rows, lanes, max_g):
    """Pack `g` input rows per output row so the output tile is lane-dense
    (>= 128 lanes, ideally a multiple of 128) when s*s*W is small."""
    if lanes >= 128 or rows <= 1 or max_g < 2:
        return 1
    need = 128 // math.gcd(lanes, 128)      # smallest g with (g*lanes) % 128 == 0
    if 2 <= need <= max_g and rows % need == 0:
        return need
    for g in range(2, max_g + 1):
        if rows % g == 0 and g * lanes >= 128:
            return g
    return 1


def _choose_width_chunk(W, itemsize):
    """Contraction-chunk width for the width-only rep matmul.  Caps the rep
    matrix size and the matmul arithmetic intensity (keeps even v5e's slow f32
    MXU path under the HBM roofline) while staying 128-lane aligned."""
    max_wc = max(128, (1024 // itemsize) // 128 * 128)   # f32 -> 256, bf16/f16 -> 512
    if W <= max_wc:
        return W
    wc = max_wc
    while wc >= 128:
        if W % wc == 0:
            return wc
        wc -= 128
    # TODO(synk): very wide rows with no 128-multiple divisor fall back to an
    # unchunked rep (bigger matmul / rep matrix, still correct).
    return W


# -----------------------------------------------------------------------------
# Wrapper
# -----------------------------------------------------------------------------

def upsample_nearest(x: jax.Array, scale_factor) -> jax.Array:
    """Nearest-neighbor upsampling of an NCHW tensor by an integer factor."""
    s = int(scale_factor)
    if float(scale_factor) != float(s) or s < 1:
        # TODO(synk): float / per-axis scale factors of nn.Upsample not implemented.
        raise NotImplementedError("only positive integer scale_factor is supported")
    if x.ndim != 4:
        # TODO(synk): 3-D / 5-D nearest upsampling not implemented.
        raise NotImplementedError("only NCHW (4-D) inputs are supported")
    if not jnp.issubdtype(x.dtype, jnp.floating):
        # TODO(synk): integer dtypes need a non-MXU copy path for exactness.
        raise NotImplementedError("only floating dtypes are supported")
    if s == 1:
        return x

    N, C, H, W = x.shape
    M = N * C * H                 # collapsed row axis
    Wo = W * s                    # upsampled width
    Wp = s * Wo                   # lane-packed output slab row (s height copies)
    itemsize = jnp.dtype(x.dtype).itemsize
    sub = _sublane(itemsize)
    vmem_limit = _vmem_limit_bytes()
    # f32 through the MXU must not be rounded to bf16 (rep is an exact 0/1 copy
    # matrix); bf16/f16 with f32 accumulation are exact with default precision.
    precision = (jax.lax.Precision.HIGHEST if x.dtype == jnp.float32
                 else jax.lax.Precision.DEFAULT)
    params = lambda sem: pltpu.CompilerParams(   # noqa: E731
        dimension_semantics=sem, vmem_limit_bytes=vmem_limit)

    if Wo >= 128:
        # ------------------ width-only rep path (large W) ---------------------
        wc = _choose_width_chunk(W, itemsize)
        nw = W // wc if W % wc == 0 else 1
        if nw * wc != W:
            wc, nw = W, 1
        wcs = wc * s
        x2 = x.reshape(M, W)
        # rep[w, k] = 1 iff k // s == w  (width repeat only)
        cols = jnp.arange(wcs, dtype=jnp.int32) // s
        rep = (cols[None, :] == jnp.arange(wc, dtype=jnp.int32)[:, None]).astype(x.dtype)

        rep_bytes = wc * wcs * itemsize
        per_row = 2 * (W + Wp) * itemsize                       # double-buffered in + out
        budget = vmem_limit - 2 * rep_bytes - (4 << 20)          # 2x: rep is double-buffered too
        br = _choose_row_block(M, per_row, budget, sub)

        cost = pl.CostEstimate(
            flops=2 * M * W * wc * s,                            # width-only matmul work
            transcendentals=0,
            bytes_accessed=(M * W + M * Wp + wc * wcs) * itemsize)

        out2 = pl.pallas_call(
            functools.partial(_width_rep_kernel, s=s, wc=wc, nw=nw, precision=precision),
            out_shape=jax.ShapeDtypeStruct((M, Wp), x.dtype),
            grid=(pl.cdiv(M, br),),
            in_specs=[
                pl.BlockSpec((wc, wcs), lambda i: (0, 0)),       # chunk rep, VMEM-resident
                pl.BlockSpec((br, W), lambda i: (i, 0)),         # input row block
            ],
            out_specs=pl.BlockSpec((br, Wp), lambda i: (i, 0)),
            compiler_params=params(("parallel",)),
            cost_estimate=cost,
        )(rep, x2)
        return out2.reshape(N, C, H * s, W * s)

    # -------------------- full rep path (small W, lane packing) ---------------
    max_g = min(M, max(1, 4096 // Wp),
                max(1, math.isqrt((2 << 20) // max(1, W * Wp * itemsize))))
    g = _choose_group(M, Wp, max_g)
    Mg = M // g
    x2 = x.reshape(Mg, g * W)

    # rep[w, j*Wo + k] = 1 iff k // s == w   (width + height repeat), block-diag over g
    cols = jnp.arange(Wp, dtype=jnp.int32)
    src = (cols % Wo) // s
    small = (src[None, :] == jnp.arange(W, dtype=jnp.int32)[:, None]).astype(x.dtype)
    rep = small if g == 1 else jnp.kron(jnp.eye(g, dtype=x.dtype), small)

    rep_bytes = (g * W) * (g * Wp) * itemsize
    per_row = 2 * (g * W + g * Wp) * itemsize
    budget = vmem_limit - 2 * rep_bytes - (4 << 20)
    br = _choose_row_block(Mg, per_row, budget, sub)

    cost = pl.CostEstimate(
        flops=2 * Mg * (g * W) * (g * Wp),
        transcendentals=0,
        bytes_accessed=(M * W + M * Wp + g * g * W * Wp) * itemsize)

    out2 = pl.pallas_call(
        functools.partial(_full_rep_kernel, precision=precision),
        out_shape=jax.ShapeDtypeStruct((Mg, g * Wp), x.dtype),
        grid=(pl.cdiv(Mg, br),),
        in_specs=[
            pl.BlockSpec((g * W, g * Wp), lambda i: (0, 0)),     # rep matrix, VMEM-resident
            pl.BlockSpec((br, g * W), lambda i: (i, 0)),         # packed input row block
        ],
        out_specs=pl.BlockSpec((br, g * Wp), lambda i: (i, 0)),
        compiler_params=params(("parallel",)),
        cost_estimate=cost,
    )(rep, x2)

    # (Mg, g*Wp) == (N*C*H, s*W*s) flat == contiguous layout of (N, C, H*s, W*s).
    return out2.reshape(N, C, H * s, W * s)


class UpSample:
    """JAX/Pallas equivalent of the PyTorch UpSample wrapper module."""

    def __init__(self, scale_factor, mode="nearest"):
        if mode != "nearest":
            # TODO(synk): bilinear / other interpolation modes are not implemented.
            raise NotImplementedError("only mode='nearest' is implemented")
        self.scale_factor = scale_factor

    def __call__(self, inputs, **kwargs):
        return upsample_nearest(inputs, self.scale_factor)


if __name__ == "__main__":
    key = jax.random.PRNGKey(0)
    k1, k2, k3, k4, k5 = jax.random.split(key, 5)

    def ref_upsample(a, s):
        return jnp.repeat(jnp.repeat(a, s, axis=2), s, axis=3)

    # 1) f32, s=2, small W -> packed full-rep path (g=2 -> 128-lane output tiles).
    x = jax.random.normal(k1, (2, 4, 16, 16), dtype=jnp.float32)
    out = jax.block_until_ready(UpSample(scale_factor=2, mode="nearest")(x))
    assert out.shape == (2, 4, 32, 32), out.shape
    assert out.dtype == x.dtype, out.dtype
    assert jnp.array_equal(out, ref_upsample(x, 2)), "mismatch (f32, s=2)"

    # 2) f32, s=3, odd row count -> full-rep path with a partial boundary block.
    x3 = jax.random.normal(k2, (1, 3, 8, 8), dtype=jnp.float32)
    out3 = jax.block_until_ready(UpSample(scale_factor=3)(x3))
    assert out3.shape == (1, 3, 24, 24), out3.shape
    assert jnp.array_equal(out3, ref_upsample(x3, 3)), "mismatch (f32, s=3)"

    # 3) bf16, s=2 -> native-dtype MXU path stays bit-exact.
    xb = jax.random.normal(k3, (2, 4, 16, 16), dtype=jnp.bfloat16)
    outb = jax.block_until_ready(UpSample(scale_factor=2)(xb))
    assert outb.dtype == jnp.bfloat16, outb.dtype
    assert jnp.array_equal(outb, ref_upsample(xb, 2)), "mismatch (bf16, s=2)"

    # 4) f32, s=2, wide rows -> width-only rep path (s stores per row block).
    xw = jax.random.normal(k4, (1, 2, 8, 256), dtype=jnp.float32)
    outw = jax.block_until_ready(UpSample(scale_factor=2)(xw))
    assert outw.shape == (1, 2, 16, 512), outw.shape
    assert jnp.array_equal(outw, ref_upsample(xw, 2)), "mismatch (f32 wide, s=2)"

    # 5) f32, s=2, very wide rows -> width-chunked rep (nw > 1 in-kernel chunks).
    xc = jax.random.normal(k5, (1, 1, 8, 1024), dtype=jnp.float32)
    outc = jax.block_until_ready(UpSample(scale_factor=2)(xc))
    assert outc.shape == (1, 1, 16, 2048), outc.shape
    assert jnp.array_equal(outc, ref_upsample(xc, 2)), "mismatch (f32 chunked, s=2)"

    print("KERNEL_OK")
</pallas_src>

<mosaic_0001>
module attributes {stable_mosaic.version = 11 : i64} {
  func.func @_full_rep_kernel(%arg0: i32, %arg1: memref<32x128xf32, #tpu.memory_space<vmem>>, %arg2: memref<32x32xf32, #tpu.memory_space<vmem>>, %arg3: memref<32x128xf32, #tpu.memory_space<vmem>>) attributes {dimension_semantics = [#tpu.dimension_semantics<parallel>], iteration_bounds = array<i64: 2>, scalar_prefetch = 0 : i64, scratch_operands = 0 : i64, tpu.core_type = #tpu.core_type<tc>, window_params = [{pipeline_mode = #tpu.pipeline_mode<synchronous>, transform_indices = @transform_0, window_bounds = array<i64: 32, 128>}, {transform_indices = @transform_1, window_bounds = array<i64: 32, 32>}, {transform_indices = @transform_2, window_bounds = array<i64: 32, 128>}]} {
    %c0 = arith.constant 0 : index
    %c0_0 = arith.constant 0 : index
    %0 = vector.load %arg2[%c0, %c0_0] : memref<32x32xf32, #tpu.memory_space<vmem>>, vector<32x32xf32>
    %c0_1 = arith.constant 0 : index
    %c0_2 = arith.constant 0 : index
    %1 = vector.load %arg1[%c0_1, %c0_2] : memref<32x128xf32, #tpu.memory_space<vmem>>, vector<32x128xf32>
    %cst = arith.constant dense<0.000000e+00> : vector<32x128xf32>
    %2 = tpu.matmul %0, %1, %cst {dimension_numbers = #tpu.dot_dimension_numbers<[1], [0], [0], [1], [0, 0, 1, 1], [], []>, precision = #tpu.contract_precision<fp32>} : vector<32x32xf32>, vector<32x128xf32>, vector<32x128xf32> -> vector<32x128xf32>
    %c0_3 = arith.constant 0 : index
    %c0_4 = arith.constant 0 : index
    %3 = vector.load %arg3[%c0_3, %c0_4] : memref<32x128xf32, #tpu.memory_space<vmem>>, vector<32x128xf32>
    tpu.vector_store %arg3[%c0_3, %c0_4], %2 {strides = array<i32>} : memref<32x128xf32, #tpu.memory_space<vmem>>, vector<32x128xf32>,
    return
  }
  func.func @transform_0(%arg0: i32) -> (i32, i32) {
    %c0_i32 = arith.constant 0 : i32
    %c0_i32_0 = arith.constant 0 : i32
    %c0_i32_1 = arith.constant 0 : i32
    return %c0_i32, %c0_i32_0 : i32, i32
  }
  func.func @transform_1(%arg0: i32) -> (i32, i32) {
    %c0_i32 = arith.constant 0 : i32
    %c0_i32_0 = arith.constant 0 : i32
    return %arg0, %c0_i32 : i32, i32
  }
  func.func @transform_2(%arg0: i32) -> (i32, i32) {
    %c0_i32 = arith.constant 0 : i32
    %c0_i32_0 = arith.constant 0 : i32
    return %arg0, %c0_i32 : i32, i32
  }
}

</mosaic_0001>

<bundles_post_ra>
// kernel: tpu_custom_call.1
= control target key start
LH: loop header
LB: loop body
LE: loop exit
PB: predicated region body
PF: predicated region fallthrough
CT: control target
= control target key end

     0   :  { %7 = vsyncpa [#allocation3], 0  ;;  %s1362_s0 = inlined_call_operand.vmem [shape: f32[32,128], index: 0, kind: input, shape index: {}]   ;;  %s1363_s1 = inlined_call_operand.vmem [shape: f32[64,32], index: 1, kind: input, shape index: {}]   ;;  %s1364_s2 = inlined_call_operand.hbm [shape: f32[64,128], index: 2, kind: output, shape index: {}]  }
   0x1   :  { %9 = vsyncpa [#allocation3 + $0x1], 0  ;;  %s1196_s9 = smov 0   ;;  %s1198_s10 = smov 0  }
   0x2   :  { %s1200_s11 = smov 0   ;;  %s1202_s12 = smov 0  }
   0x3 LB: > { %s1217_s13 = sadd.s32 4294967295, %s1176_s12   ;;  %s860_s14 = sadd.s32 4294967294, %s1176_s12   ;;  %s1176_s12 = sphi %s1202_s12, %s1370_s12   ;;  %s1172_s11 = sphi %s1200_s11, %s1369_s11   ;;  %s1168_s10 = sphi %s1198_s10, %s1368_s10   ;;  %s1164_s9 = sphi %s1196_s9, %s1367_s9  }
   0x4   : > { %s1221_s15 = sadd.s32 1, %s1176_s12   ;;  %s69_s16 = sadd.s32 1, %s1172_s11 }
   0x5   : > { %s66_s17 = ssub.s32 %s1176_s12, %s1221_s15  ;;  %p79_p0 = scmp.ne.s32.totalorder %s1172_s11, %s1168_s10 }
   0x6   : > { %p67_p1 = scmp.eq.s32.totalorder %s66_s17, 0  ;;  %p80_p2 = scmp.eq.s32.totalorder %s1217_s13, 1 }
   0x7   : > { %p85_p3 = scmp.ne.s32.totalorder %s1168_s10, %s1164_s9  ;;  %p86_p4 = scmp.eq.s32.totalorder %s860_s14, 1 }
   0x8   : > { %s1232_s18 = scalar_select %p67_p1, %s1172_s11, %s69_s16  }
   0x9   : > { %p1234_p5 = por %p80_p2, %p79_p0  ;;  %p1238_p6 = por %p86_p4, %p85_p3 }
   0xa   : > { %p863_p7 = scmp.ge.s32.totalorder %s1176_s12, 1  ;;  %p116_p8 = scmp.lt.s32.totalorder %s1176_s12, 3 }
   0xc   : > { %p117_p9 = pnand %p863_p7, %p116_p8 }
   0xd   : > { %v149_v0 = vld [vmem:[%s1362_s0] sm:$0xff] (!%p117_p9)  ;;  %v150_v1 = vld [vmem:[%s1362_s0 + $0x8] sm:$0xff] (!%p117_p9)  ;;  %v151_v2 = vld [vmem:[%s1362_s0 + $0x10] sm:$0xff] (!%p117_p9)  ;;  %s865_s27 = sshll.u32 (!%p117_p9), %s1217_s13, 2  ;;  %vm153_vm0 = vcmask (!%p117_p9), 261120   ;;  %s135_s6 = sand.u32 (!%p117_p9), 1, %s1168_s10  }
   0xe   : > { %120 = sbr.rel (%p117_p9) target bundleno = 287 (0x11f), region = 28  ;;  %v167_v3 = vand.u32 (!%p117_p9), 4294901760, %v149_v0  ;;  %v170_v4 = vand.u32 (!%p117_p9), 4294901760, %v150_v1  ;;  %v152_v5 = vld [vmem:[%s1362_s0 + $0x18] sm:$0xff] (!%p117_p9)  ;;  %v173_v6 = vand.u32 (!%p117_p9), 4294901760, %v151_v2  ;;  %p139_p10 = scmp.lt.s32.totalorder (!%p117_p9), %s865_s27, 7 }
   0xf   : > { %v176_v7 = vand.u32 (!%p117_p9), 4294901760, %v152_v5  ;;  %s864_s7 = sshll.u32 (!%p117_p9), %s135_s6, 5  ;;  %s872_s16 = sshll.u32 (!%p117_p9), %s1217_s13, 9 }
  0x10   : > { %v1257_v8 = vpack.c.bf16 (!%p117_p9), %v170_v4, %v167_v3  ;;  %v1259_v9 = vsub.f32 (!%p117_p9), %v149_v0, %v167_v3  ;;  %v1261_v10 = vsub.f32 (!%p117_p9), %v150_v1, %v170_v4  ;;  %v1263_v11 = vsub.f32 (!%p117_p9), %v151_v2, %v173_v6  ;;  %s137_s8 = scalar_lea.vmem (!%p117_p9), [#allocation2], %s864_s7  ;;  %s1319_s22 = scalar_lea.hbm (!%p117_p9), %s1364_s2, %s872_s16 }
  0x11   : > { %v1265_v12 = vpack.c.bf16 (!%p117_p9), %v176_v7, %v173_v6  ;;  %v1267_v13 = vsub.f32 (!%p117_p9), %v152_v5, %v176_v7  ;;  %s798_s14 = sshll.u32 (!%p117_p9), %s137_s8, 4  ;;  %s1321_s23 = scalar_lea.sflag (!%p117_p9), [#allocation3], %s135_s6  ;;  %s1314_s14 = int_to_ptr.vmem [resolvable:$true] %s798_s14 }
  0x12   : > { %1030 = vmatprep.subr.bf16.mxu0 (!%p117_p9), %v1257_v8  ;;  %1006 = vmatprep.subr.bf16.mxu1 (!%p117_p9), %v1257_v8  ;;  %v278_v14 = vand.u32 (!%p117_p9), 4294901760, %v1259_v9  ;;  %v285_v15 = vand.u32 (!%p117_p9), 4294901760, %v1261_v10  ;;  %v292_v16 = vand.u32 (!%p117_p9), 4294901760, %v1263_v11  ;;  %v1021_v58 = vpack.c.bf16 (!%p117_p9), %v1261_v10, %v1259_v9  ;;  %s1114_s13 = scalar_lea.vmem (!%p117_p9), %s1314_s14, 512  ;;  %s1178_s24 = smov (!%p117_p9), [#allocation2]  }
  0x13   : > { %1032 = vmatpush3.bf16.msra.mxu0 (!%p117_p9), %v1257_v8  ;;  %1008 = vmatpush3.bf16.msra.mxu1 (!%p117_p9), %v1257_v8  ;;  %v299_v17 = vand.u32 (!%p117_p9), 4294901760, %v1267_v13  ;;  %v1025_v59 = vpack.c.bf16 (!%p117_p9), %v1267_v13, %v1263_v11  ;;  %p1115_p11 = scmp.ne.s32.totalorder (!%p117_p9), %s1314_s14, %s1114_s13  ;;  %s1118_s25 = sshll.u32 (!%p117_p9), %s1178_s24, 4  ;;  %s1119_s25 = int_to_ptr.vmem [resolvable:$false] %s1118_s25 }
  0x14   : > { %1034 = vmatprep.subr.bf16.mxu0 (!%p117_p9), %v1265_v12  ;;  %1010 = vmatprep.subr.bf16.mxu1 (!%p117_p9), %v1265_v12  ;;  %v1037_v20 = vpack.c.bf16 (!%p117_p9), %v285_v15, %v278_v14  ;;  %v279_v21 = vsub.f32 (!%p117_p9), %v1259_v9, %v278_v14  ;;  %v286_v22 = vsub.f32 (!%p117_p9), %v1261_v10, %v285_v15  ;;  %s1120_s26 = scalar_lea.vmem (!%p117_p9), %s1119_s25, 1024  ;;  %p1121_p0 = scmp.lt.s32.totalorder (!%p117_p9), %s1314_s14, %s1119_s25 }
  0x15   : > { %s1372_s27 = smov (!%p139_p10, %s865_s27), 7  ;;  %v293_v34 = vsub.f32 %v1263_v11, %v292_v16  ;;  %v300_v35 = vsub.f32 %v1267_v13, %v299_v17  ;;  %v1041_v45 = vpack.c.bf16 %v299_v17, %v292_v16  ;;  %p1116_p12 = pnand %p1115_p11, %p1234_p5 }
  0x16   : > { %s866_s30 = sshll.u32 %s1372_s27, 3  ;;  %v280_v30 = vand.u32 4294901760, %v279_v21  ;;  %v287_v31 = vand.u32 4294901760, %v286_v22  ;;  %p1122_p1 = scmp.lt.s32.totalorder %s1120_s26, %s1114_s13 }
  0x17   : > { %s142_s5 = scalar_lea.vmem %s1363_s1, %s866_s30  ;;  %1036 = vmatpush3.bf16.msra.mxu0 %v1265_v12  ;;  %1012 = vmatpush3.bf16.msra.mxu1 %v1265_v12  ;;  %v294_v46 = vand.u32 4294901760, %v293_v34  ;;  %v301_v47 = vand.u32 4294901760, %v300_v35  ;;  %p1117_p13 = pneg %p1116_p12 }
  0x18   : > { %v145_v18 = vld [vmem:[%s142_s5] sm:$0xff]  ;;  %v146_v19 = vld [vmem:[%s142_s5 + $0x8] sm:$0xff]  ;;  %v147_v23 = vld [vmem:[%s142_s5 + $0x10] sm:$0xff]  ;;  %1038 = vmatprep.subr.bf16.mxu0 %v1037_v20  ;;  %v1013_v38 = vpack.c.bf16 %v287_v31, %v280_v30  ;;  %p1123_p2 = por %p1122_p1, %p1121_p0 }
  0x19   : > { %v155_v24 = vsel %vm153_vm0, %v145_v18, 0  ;;  %v158_v25 = vsel %vm153_vm0, %v146_v19, 0  ;;  %v161_v26 = vsel %vm153_vm0, %v147_v23, 0  ;;  %v148_v27 = vld [vmem:[%s142_s5 + $0x18] sm:$0xff]  ;;  %v1017_v56 = vpack.c.bf16 %v301_v47, %v294_v46 }
  0x1a   : > { %v1287_v28 = vand.u32 4294901760, %v155_v24  ;;  %v1289_v29 = vand.u32 4294901760, %v158_v25  ;;  %v255_v32 = vand.u32 4294901760, %v161_v26  ;;  %v164_v33 = vsel %vm153_vm0, %v148_v27, 0  ;;  %1014 = vmatprep.subr.bf16.mxu1 %v1013_v38  ;;  %p1124_p3 = pnand %p1123_p2, %p1117_p13 }
  0x1b   : > { %v265_v39 = vand.u32 4294901760, %v164_v33 }
  0x1c   : > { %v236_v36 = vsub.f32 %v155_v24, %v1287_v28  ;;  %v246_v37 = vsub.f32 %v158_v25, %v1289_v29  ;;  %v256_v40 = vsub.f32 %v161_v26, %v255_v32 }
  0x1d   : > { %v266_v43 = vsub.f32 %v164_v33, %v265_v39 }
  0x1e   : > { %v237_v41 = vand.u32 4294901760, %v236_v36  ;;  %v247_v42 = vand.u32 4294901760, %v246_v37  ;;  %v257_v44 = vand.u32 4294901760, %v256_v40 }
  0x1f   : > { %v267_v50 = vand.u32 4294901760, %v266_v43 }
  0x20   : > { %971 = vmatprep.mubr.f32.mxu0 %v237_v41  ;;  %v238_v48 = vsub.f32 %v236_v36, %v237_v41  ;;  %v248_v49 = vsub.f32 %v246_v37, %v247_v42  ;;  %v258_v51 = vsub.f32 %v256_v40, %v257_v44 }
  0x21   : > { %972 = vmatmul.mubr.f32.vlgmr.msra.gmra.mrb[0].mxu0 %v247_v42  ;;  %v268_v54 = vsub.f32 %v266_v43, %v267_v50 }
  0x22   : > { %1040 = vmatpush3.bf16.msra.mxu0 %v1037_v20  ;;  %v239_v52 = vand.u32 4294901760, %v238_v48  ;;  %974 = vmatprep.mubr.f32.mxu0 %v257_v44  ;;  %v249_v53 = vand.u32 4294901760, %v248_v49  ;;  %v259_v55 = vand.u32 4294901760, %v258_v51 }
  0x23   : > { %1042 = vmatprep.subr.bf16.mxu0 %v1041_v45  ;;  %v269_v57 = vand.u32 4294901760, %v268_v54 }
  0x24   : > { %929 = vmatprep.mubr.f32.mxu1 %v239_v52 }
  0x25   : > { %930 = vmatmul.mubr.f32.vlgmr.msra.gmra.mrb[0].mxu1 %v249_v53  ;;  %975 = vmatmul.mubr.f32.gmra.mrb[2].mxu0 %v267_v50 }
  0x26   : > { %1016 = vmatpush3.bf16.msra.mxu1 %v1013_v38  ;;  %1044 = vmatpush3.bf16.msra.mxu0 %v1041_v45 }
  0x27   : > { %932 = vmatprep.mubr.f32.mxu1 %v259_v55  ;;  %1018 = vmatprep.subr.bf16.mxu1 %v1017_v56 }
  0x28   : > { %985 = vmatprep.mubr.f32.mxu0 %v1287_v28  ;;  %1046 = vmatprep.subr.bf16.mxu0 %v1257_v8 }
  0x29   : > { %933 = vmatmul.mubr.f32.gmra.mrb[2].mxu1 %v269_v57  ;;  %986 = vmatmul.mubr.f32.vlgmr.msra.gmra.mrb[0].mxu0 %v1289_v29 }
  0x2a   : > { %1020 = vmatpush3.bf16.msra.mxu1 %v1017_v56  ;;  %1048 = vmatpush3.bf16.msra.mxu0 %v1257_v8 }
  0x2b   : > { %943 = vmatprep.mubr.f32.mxu1 %v1287_v28  ;;  %1022 = vmatprep.subr.bf16.mxu1 %v1021_v58 }
  0x2c   : > { %988 = vmatprep.mubr.f32.mxu0 %v255_v32  ;;  %1050 = vmatprep.subr.bf16.mxu0 %v1265_v12 }
  0x2d   : > { %944 = vmatmul.mubr.f32.vlgmr.msra.gmra.mrb[0].mxu1 %v1289_v29  ;;  %989 = vmatmul.mubr.f32.gmra.mrb[2].mxu0 %v265_v39 }
  0x2e   : > { %1024 = vmatpush3.bf16.msra.mxu1 %v1021_v58  ;;  %1052 = vmatpush3.bf16.msra.mxu0 %v1265_v12 }
  0x2f   : > { %946 = vmatprep.mubr.f32.mxu1 %v255_v32  ;;  %1026 = vmatprep.subr.bf16.mxu1 %v1025_v59 }
  0x30   : > { %999 = vmatprep.mubr.f32.mxu0 %v1287_v28 }
  0x31   : > { %947 = vmatmul.mubr.f32.gmra.mrb[2].mxu1 %v265_v39  ;;  %1000 = vmatmul.mubr.f32.vlgmr.msra.gmra.mrb[0].mxu0 %v1289_v29 }
  0x32   : > { %1028 = vmatpush3.bf16.msra.mxu1 %v1025_v59  ;;  %957 = vmatprep.mubr.f32.mxu1 %v236_v36 }
  0x33   : > { %1002 = vmatprep.mubr.f32.mxu0 %v255_v32 }
  0x35   : > { %958 = vmatmul.mubr.f32.vlgmr.msra.gmra.mrb[0].mxu1 %v246_v37  ;;  %1003 = vmatmul.mubr.f32.gmra.mrb[2].mxu0 %v265_v39 }
  0x36   : > { %960 = vmatprep.mubr.f32.mxu1 %v256_v40 }
  0x39   : > { %961 = vmatmul.mubr.f32.gmra.mrb[2].mxu1 %v266_v43 }
 0x104   : > { %v1001_v60 = vpop.f32.mrb[0].mxu0 }
 0x105   : > { %v758_v61 = vpop.f32.mrb[1].mxu0 }
 0x108   : > { %v959_v62 = vpop.f32.mrb[0].mxu1  ;;  %v1004_v63 = vpop.f32.mrb[2].mxu0 }
 0x109   : > { %v1053_v0 = vadd.f32 %v1001_v60, %v959_v62  ;;  %v460_v1 = vpop.f32.mrb[1].mxu1  ;;  %v770_v2 = vpop.f32.mrb[3].mxu0 }
 0x10a   : > { %v1054_v3 = vadd.f32 %v758_v61, %v460_v1 }
 0x10b   : > { %781 = vst [vmem:[%s137_s8 + $0x8] sm:$0xff] %v1053_v0 }
 0x10c   : > { %780 = vst [vmem:[%s137_s8] sm:$0xff] %v1054_v3  ;;  %v962_v4 = vpop.f32.mrb[2].mxu1 }
 0x10d   : > { %v1055_v5 = vadd.f32 %v1004_v63, %v962_v4  ;;  %v474_v6 = vpop.f32.mrb[3].mxu1 }
 0x10e   : > { %v1056_v7 = vadd.f32 %v770_v2, %v474_v6 }
 0x10f   : > { %783 = vst [vmem:[%s137_s8 + $0x18] sm:$0xff] %v1055_v5 }
 0x110   : > { %782 = vst [vmem:[%s137_s8 + $0x10] sm:$0xff] %v1056_v7 }
 0x111   : > { %1127 = shalt.err (!%p1124_p3)
}
 0x112   : > { %s1128_s27 = scalar_lea.hbm %s1319_s22, 512  ;;  %s1132_s30 = scalar_lea.hbm %s1364_s2, 1024 }
 0x113   : > { %p1129_p4 = scmp.ne.s32.totalorder %s1319_s22, %s1128_s27  ;;  %p1133_p9 = scmp.lt.u32.totalorder %s1319_s22, %s1364_s2 }
 0x114   : > { %p1134_p10 = scmp.lt.u32.totalorder %s1132_s30, %s1128_s27  ;;  %p1136_p12 = scmp.lt.u32.totalorder %s1128_s27, %s1319_s22 }
 0x115   : > { %p1130_p7 = pnand %p1129_p4, %p1234_p5 }
 0x116   : > { %p1135_p11 = por %p1134_p10, %p1133_p9 }
 0x117   : > { %p1131_p8 = pneg %p1130_p7 }
 0x118   : > { %p1137_p13 = por %p1136_p12, %p1135_p11 }
 0x11a   : > { %p1138_p0 = pnand %p1137_p13, %p1131_p8 }
 0x11c   : > { %1141 = shalt.err (!%p1138_p0)
}
 0x11d   : > { %s1179_s5 = smov 128   ;;  %s1180_s6 = smov 8  }
 0x11e   : > { %1073 = dma.vmem_to_hbm [thread:$0]  (%p1234_p5), %s1314_s14, 512, %s1319_s22, %s1321_s23, %s1179_s5, %s1179_s5, %s1180_s6  }
 0x11f PF: > { %p1079_p1 = scmp.ge.s32.totalorder %s1176_s12, 2  ;;  %s813_s7 = sand.u32 1, %s1164_s9  }
 0x120   : > { %s814_s8 = scalar_lea.sflag [#allocation3], %s813_s7 }
 0x121   : > { %p1076_p2 = pnand %p1079_p1, %p1238_p6 }
 0x123   : > { %1159 = dma.done.wait (!%p1076_p2), %s814_s8, 512  }
 0x124   : > { %1161 = vsyncadd (!%p1076_p2), %s814_s8, 4294966784  ;;  %p12_p3 = scmp.ge.s32.totalorder %s1221_s15, 4   ;;  %s1367_s9 = smov %s1168_s10 }
 0x125   : > { %s1368_s10 = smov %s1172_s11  ;;  %s1369_s11 = smov %s1232_s18 }
 0x126   : > { %s1370_s12 = smov %s1221_s15  ;;  %14 = sbr.rel (!%p12_p3) target bundleno = 3 (0x3), region = 63 }
 0x12d   :  { %819 = vsyncpa [#allocation3], 1 }
 0x12e   :  { %821 = vsyncpa [#allocation3 + $0x1], 1 }

</bundles_post_ra>
